<compile_context>
chip_gen: v7x
topology: tpu7x:2x2x1
jax: 0.10.0
libtpu: 0.0.40
codegen_flags: <defaults>
</compile_context>

<pallas_src>
import jax
import jax.numpy as jnp
from jax.experimental import pallas as pl
from jax.experimental.pallas import tpu as pltpu


# ---------------------------------------------------------------------------
# Kernels
# ---------------------------------------------------------------------------
def _gemm_stats_kernel(p_ref, w_ref, conv_ref, sum_ref, sumsq_ref):
    """Per-tile GEMM on the MXU + per-channel sum / sum-of-squares.

    p_ref:     [1, K_pad, T]    bf16 im2col patch tile (one image's hw slab)
    w_ref:     [C_pad, K_pad]   bf16 weights (constant block -> resident)
    conv_ref:  [1, C_pad, T]    bf16 conv tile written back to HBM
    sum_ref:   [1, C_pad, 1]    f32 per-core channel-sum accumulator (resident)
    sumsq_ref: [1, C_pad, 1]    f32 per-core channel-sum-of-squares accumulator
    """
    b = pl.program_id(1)          # image index
    j = pl.program_id(2)          # spatial tile index within this core

    conv = jnp.dot(w_ref[...], p_ref[0],
                   preferred_element_type=jnp.float32)        # [C_pad, T] f32

    @pl.when((b == 0) & (j == 0))
    def _():
        sum_ref[...] = jnp.zeros_like(sum_ref)
        sumsq_ref[...] = jnp.zeros_like(sumsq_ref)

    # Statistics from the exact f32 MXU result; the HBM intermediate is bf16.
    sum_ref[0] += jnp.sum(conv, axis=1, keepdims=True)
    sumsq_ref[0] += jnp.sum(conv * conv, axis=1, keepdims=True)
    conv_ref[0] = conv.astype(conv_ref.dtype)


def _bn_lrelu_kernel(conv_ref, scale_ref, shift_ref, o_ref):
    """Fused BatchNorm affine + LeakyReLU(0.2), NCHW in / NCHW out.

    conv_ref:  [1, C_pad, T] bf16
    scale_ref: [C_pad, 1]    f32   gamma * rsqrt(var + eps)
    shift_ref: [C_pad, 1]    f32   beta - mean * scale
    o_ref:     [1, C_pad, T] f32
    """
    y = conv_ref[0].astype(jnp.float32) * scale_ref[...] + shift_ref[...]
    o_ref[0] = jnp.maximum(y, 0.2 * y)            # single VALU op for LeakyReLU


# ---------------------------------------------------------------------------
# Wrapper helpers
# ---------------------------------------------------------------------------
def _round_up(x, mult):
    return ((x + mult - 1) // mult) * mult


def _tpu_config():
    """(num_tensorcores_per_chip, vmem_cap_bytes, target_spatial_tile)."""
    kind = ""
    try:
        kind = jax.devices()[0].device_kind.lower()
    except Exception:
        pass
    if "v7" in kind or "7x" in kind:
        # 2 TCs / chip, 64 MiB VMEM per TC -> keep the scoped limit well below.
        return 2, 44 * 1024 * 1024, 512
    if "v5e" in kind or "v5 lite" in kind or "v5lite" in kind:
        # 1 TC, 128 MiB VMEM; deep layers are MXU-bound -> bigger tiles buy
        # nothing on pass 1, so keep the tile moderate.
        return 1, 96 * 1024 * 1024, 512
    # v6e (and default): 1 TC, 128 MiB VMEM, memory-bound -> big tiles.
    return 1, 96 * 1024 * 1024, 1024


def _p1_bytes(t, k_pad, c_pad):
    """Approximate pass-1 VMEM working set for a spatial tile of width t."""
    return (2 * k_pad * t * 2          # double-buffered bf16 patch tile
            + 2 * c_pad * k_pad * 2    # weight block (budget 2 buffers)
            + 2 * c_pad * t * 2        # double-buffered bf16 conv tile
            + c_pad * t * 4            # f32 MXU result before the bf16 cast
            + 8 * c_pad * 4)           # stats accumulators


def _pick_hw_tile(hw_pad, target, k_pad, c_pad, vmem_cap):
    """Largest 128-multiple divisor of hw_pad that is <= target and whose
    pass-1 working set stays within ~80% of the per-generation VMEM budget."""
    best = 128
    t = 128
    while t <= hw_pad:
        if (hw_pad % t == 0 and t <= target
                and _p1_bytes(t, k_pad, c_pad) <= int(0.8 * vmem_cap)):
            best = t
        t += 128
    return best


def _im2col_reflect_nchw(x, stride):
    """x: [N, C, H, W] f32 -> bf16 patches [N, K, HW] (reflect pad=1, 4x4 taps).

    K is ordered (c_in, kh, kw) row-major == PyTorch Conv2d weight layout.
    The taps stack directly into the K axis, so NO transpose is needed, and
    the cast to bf16 happens before the 16x expansion (halves XLA HBM traffic).
    """
    n, c, h, w = x.shape
    xb = x.astype(jnp.bfloat16)
    xp = jnp.pad(xb, ((0, 0), (0, 0), (1, 1), (1, 1)), mode="reflect")
    h_out = (h + 2 - 4) // stride + 1
    w_out = (w + 2 - 4) // stride + 1
    taps = []
    for kh in range(4):
        for kw in range(4):
            taps.append(xp[:, :, kh:kh + stride * (h_out - 1) + 1:stride,
                               kw:kw + stride * (w_out - 1) + 1:stride])
    patches = jnp.stack(taps, axis=2)             # [N, C, 16, H_out, W_out]
    # TODO(synk): longer term, gather the 4x4 taps inside the kernel so the
    # 16x-expanded patch matrix never materializes in HBM.
    return patches.reshape(n, c * 16, h_out * w_out), h_out, w_out


# ---------------------------------------------------------------------------
# Forward
# ---------------------------------------------------------------------------
def cnn_block_forward(x, weight, gamma, beta, stride, eps=1e-5):
    """x: [N, C_in, H, W] f32; weight: [C_out, C_in, 4, 4]; gamma/beta: [C_out].
    Returns [N, C_out, H_out, W_out] f32 (training-mode BatchNorm)."""
    n, c_in, h, w = x.shape
    c_out = weight.shape[0]

    n_cores, vmem_cap, t_target = _tpu_config()

    patches, h_out, w_out = _im2col_reflect_nchw(x, stride)   # [N, K, HW] bf16
    _, k, hw = patches.shape
    m = n * hw                                     # true #positions for BN stats

    k_pad = _round_up(k, 128)
    c_pad = _round_up(c_out, 128)
    hw_pad = _round_up(hw, 128)

    # Spatial tile (the GEMM's N dim), gated by the per-generation VMEM budget.
    t1 = _pick_hw_tile(hw_pad, t_target, k_pad, c_pad, vmem_cap)
    hw_tiles = hw_pad // t1
    if hw_tiles < n_cores:            # too little work to split across cores
        n_cores = 1
    hpc = -(-hw_tiles // n_cores)     # spatial tiles per core
    hw_pad2 = n_cores * hpc * t1      # extra padded columns are zero patches

    p3 = jnp.pad(patches, ((0, 0), (0, k_pad - k), (0, hw_pad2 - hw)))
    w2 = jnp.pad(weight.reshape(c_out, k).astype(jnp.bfloat16),
                 ((0, c_pad - c_out), (0, k_pad - k)))
    gamma_col = jnp.pad(gamma.astype(jnp.float32), (0, c_pad - c_out),
                        constant_values=1.0).reshape(c_pad, 1)
    beta_col = jnp.pad(beta.astype(jnp.float32),
                       (0, c_pad - c_out)).reshape(c_pad, 1)

    vmem_p1 = min(vmem_cap, max(32 * 1024 * 1024,
                                int(1.25 * _p1_bytes(t1, k_pad, c_pad))))

    # ---- pass 1: tiled GEMM + per-channel sum / sum-of-squares --------------
    # Leading "parallel" axis -> both TensorCores on v7x; per-core partial
    # accumulators avoid any cross-core race.
    conv_t, ssum, ssq = pl.pallas_call(
        _gemm_stats_kernel,
        out_shape=(
            jax.ShapeDtypeStruct((n, c_pad, hw_pad2), jnp.bfloat16),
            jax.ShapeDtypeStruct((n_cores, c_pad, 1), jnp.float32),
            jax.ShapeDtypeStruct((n_cores, c_pad, 1), jnp.float32),
        ),
        grid=(n_cores, n, hpc),
        in_specs=[
            pl.BlockSpec((1, k_pad, t1), lambda c, b, j: (b, 0, c * hpc + j)),
            # Constant index_map: the weight block is DMA'd once and stays
            # resident.  (pl.Buffered(1) would also drop its 2nd buffer, but is
            # omitted to stay conservative across jax versions.)
            pl.BlockSpec((c_pad, k_pad), lambda c, b, j: (0, 0)),
        ],
        out_specs=(
            pl.BlockSpec((1, c_pad, t1), lambda c, b, j: (b, 0, c * hpc + j)),
            pl.BlockSpec((1, c_pad, 1), lambda c, b, j: (c, 0, 0)),
            pl.BlockSpec((1, c_pad, 1), lambda c, b, j: (c, 0, 0)),
        ),
        compiler_params=pltpu.CompilerParams(
            dimension_semantics=("parallel", "arbitrary", "arbitrary"),
            vmem_limit_bytes=vmem_p1),
        cost_estimate=pl.CostEstimate(
            flops=2 * n * hw_pad2 * k_pad * c_pad,
            transcendentals=0,
            bytes_accessed=(n * k_pad * hw_pad2 * 2 + c_pad * k_pad * 2
                            + n * c_pad * hw_pad2 * 2
                            + 2 * n_cores * c_pad * 4)),
    )(p3, w2)

    # ---- fold BatchNorm into per-channel scale/shift (tiny, plain JAX) ------
    # Zero-padded K columns / channels / spatial columns contribute nothing to
    # the sums, so dividing by the true M gives exact training-mode statistics.
    ssum_c = jnp.sum(ssum, axis=0)               # [C_pad, 1]
    ssq_c = jnp.sum(ssq, axis=0)                 # [C_pad, 1]
    mean = ssum_c / m
    # NOTE: E[x^2]-E[x]^2 in f32 can cancel when |mean| >> std; clamp at 0.
    var = jnp.maximum(ssq_c / m - mean * mean, 0.0)
    scale = gamma_col * jax.lax.rsqrt(var + eps)
    shift = beta_col - mean * scale

    # ---- pass 2: fused affine + LeakyReLU, already in NCHW layout -----------
    vmem_p2 = min(vmem_cap, max(32 * 1024 * 1024,
                                int(1.25 * (2 * c_pad * t1 * 2     # conv in
                                            + 2 * c_pad * t1 * 4   # out
                                            + c_pad * t1 * 4       # f32 temp
                                            + 8 * c_pad * 4))))
    out_full = pl.pallas_call(
        _bn_lrelu_kernel,
        out_shape=jax.ShapeDtypeStruct((n, c_pad, hw_pad2), jnp.float32),
        grid=(n, hw_pad2 // t1),
        in_specs=[
            pl.BlockSpec((1, c_pad, t1), lambda b, j: (b, 0, j)),
            pl.BlockSpec((c_pad, 1), lambda b, j: (0, 0)),
            pl.BlockSpec((c_pad, 1), lambda b, j: (0, 0)),
        ],
        out_specs=pl.BlockSpec((1, c_pad, t1), lambda b, j: (b, 0, j)),
        compiler_params=pltpu.CompilerParams(
            dimension_semantics=("parallel", "parallel"),
            vmem_limit_bytes=vmem_p2),
        cost_estimate=pl.CostEstimate(
            flops=3 * n * c_pad * hw_pad2,
            transcendentals=0,
            bytes_accessed=n * c_pad * hw_pad2 * (2 + 4) + 2 * c_pad * 4),
    )(conv_t, scale, shift)

    # Strip channel/spatial padding; the layout is already NCHW (no transpose).
    out = out_full[:, :c_out, :hw].reshape(n, c_out, h_out, w_out)
    return out

    # TODO(synk): BatchNorm2d running_mean/running_var buffer updates (training
    # side-effect) are not modeled; forward output matches training-mode BN.


if __name__ == "__main__":
    key = jax.random.PRNGKey(0)
    k_x, k_w, k_g, k_b = jax.random.split(key, 4)

    N, C_IN, C_OUT, H, W, STRIDE = 2, 4, 8, 16, 16, 2

    x = jax.random.normal(k_x, (N, C_IN, H, W), dtype=jnp.float32)
    weight = jax.random.normal(k_w, (C_OUT, C_IN, 4, 4), dtype=jnp.float32) * 0.1
    gamma = 1.0 + 0.1 * jax.random.normal(k_g, (C_OUT,), dtype=jnp.float32)
    beta = 0.1 * jax.random.normal(k_b, (C_OUT,), dtype=jnp.float32)

    out = cnn_block_forward(x, weight, gamma, beta, STRIDE)
    jax.block_until_ready(out)

    assert out.shape == (N, C_OUT, H // STRIDE, W // STRIDE), out.shape
    assert bool(jnp.all(jnp.isfinite(out)))

    # Pure-JAX f32 reference (loose tolerance for the bf16 GEMM path).
    xp = jnp.pad(x, ((0, 0), (0, 0), (1, 1), (1, 1)), mode="reflect")
    conv_ref = jax.lax.conv_general_dilated(
        xp, weight, window_strides=(STRIDE, STRIDE), padding="VALID",
        dimension_numbers=("NCHW", "OIHW", "NCHW"))
    mu = jnp.mean(conv_ref, axis=(0, 2, 3), keepdims=True)
    vv = jnp.mean((conv_ref - mu) ** 2, axis=(0, 2, 3), keepdims=True)
    y = (conv_ref - mu) * jax.lax.rsqrt(vv + 1e-5)
    y = gamma.reshape(1, -1, 1, 1) * y + beta.reshape(1, -1, 1, 1)
    ref = jnp.maximum(y, 0.2 * y)
    max_err = float(jnp.max(jnp.abs(out - ref)))
    assert max_err < 0.15, max_err

    print("KERNEL_OK")
</pallas_src>

<mosaic_0001>
module attributes {stable_mosaic.version = 11 : i64} {
  func.func @_gemm_stats_kernel(%arg0: i32, %arg1: i32, %arg2: i32, %arg3: memref<1x128x128xbf16, #tpu.memory_space<vmem>>, %arg4: memref<128x128xbf16, #tpu.memory_space<vmem>>, %arg5: memref<1x128x128xbf16, #tpu.memory_space<vmem>>, %arg6: memref<1x128x1xf32, #tpu.memory_space<vmem>>, %arg7: memref<1x128x1xf32, #tpu.memory_space<vmem>>) attributes {dimension_semantics = [#tpu.dimension_semantics<parallel>, #tpu.dimension_semantics<arbitrary>, #tpu.dimension_semantics<arbitrary>], iteration_bounds = array<i64: 1, 2, 1>, scalar_prefetch = 0 : i64, scratch_operands = 0 : i64, tpu.core_type = #tpu.core_type<tc>, window_params = [{transform_indices = @transform_0, window_bounds = array<i64: 1, 128, 128>}, {pipeline_mode = #tpu.pipeline_mode<synchronous>, transform_indices = @transform_1, window_bounds = array<i64: 128, 128>}, {transform_indices = @transform_2, window_bounds = array<i64: 1, 128, 128>}, {transform_indices = @transform_3, window_bounds = array<i64: 1, 128, 1>}, {transform_indices = @transform_4, window_bounds = array<i64: 1, 128, 1>}]} {
    %c0 = arith.constant 0 : index
    %c0_0 = arith.constant 0 : index
    %0 = vector.load %arg4[%c0, %c0_0] : memref<128x128xbf16, #tpu.memory_space<vmem>>, vector<128x128xbf16>
    %c0_1 = arith.constant 0 : index
    %c0_2 = arith.constant 0 : index
    %c0_3 = arith.constant 0 : index
    %1 = vector.load %arg3[%c0_1, %c0_2, %c0_3] : memref<1x128x128xbf16, #tpu.memory_space<vmem>>, vector<1x128x128xbf16>
    %2 = vector.shape_cast %1 : vector<1x128x128xbf16> to vector<128x128xbf16>
    %cst = arith.constant dense<0.000000e+00> : vector<128x128xf32>
    %3 = tpu.matmul %0, %2, %cst {dimension_numbers = #tpu.dot_dimension_numbers<[1], [0], [0], [1], [0, 0, 1, 1], [], []>} : vector<128x128xbf16>, vector<128x128xbf16>, vector<128x128xf32> -> vector<128x128xf32>
    %c0_i32 = arith.constant 0 : i32
    %4 = arith.cmpi eq, %arg1, %c0_i32 : i32
    %c0_i32_4 = arith.constant 0 : i32
    %5 = arith.cmpi eq, %arg2, %c0_i32_4 : i32
    %6 = arith.andi %4, %5 : i1
    %7 = arith.extui %6 : i1 to i32
    %c0_i32_5 = arith.constant 0 : i32
    %8 = arith.cmpi ne, %7, %c0_i32_5 : i32
    scf.if %8 {
      %cst_23 = arith.constant 0.000000e+00 : f32
      %30 = vector.broadcast %cst_23 : f32 to vector<1x128x1xf32>
      %c0_24 = arith.constant 0 : index
      %c0_25 = arith.constant 0 : index
      %c0_26 = arith.constant 0 : index
      %31 = vector.load %arg6[%c0_24, %c0_25, %c0_26] : memref<1x128x1xf32, #tpu.memory_space<vmem>>, vector<1x128x1xf32>
      tpu.vector_store %arg6[%c0_24, %c0_25, %c0_26], %30 {strides = array<i32>} : memref<1x128x1xf32, #tpu.memory_space<vmem>>, vector<1x128x1xf32>,
      %cst_27 = arith.constant 0.000000e+00 : f32
      %32 = vector.broadcast %cst_27 : f32 to vector<1x128x1xf32>
      %c0_28 = arith.constant 0 : index
      %c0_29 = arith.constant 0 : index
      %c0_30 = arith.constant 0 : index
      %33 = vector.load %arg7[%c0_28, %c0_29, %c0_30] : memref<1x128x1xf32, #tpu.memory_space<vmem>>, vector<1x128x1xf32>
      tpu.vector_store %arg7[%c0_28, %c0_29, %c0_30], %32 {strides = array<i32>} : memref<1x128x1xf32, #tpu.memory_space<vmem>>, vector<1x128x1xf32>,
    } else {
    }
    %c0_6 = arith.constant 0 : index
    %c0_7 = arith.constant 0 : index
    %c0_8 = arith.constant 0 : index
    %9 = vector.load %arg6[%c0_6, %c0_7, %c0_8] : memref<1x128x1xf32, #tpu.memory_space<vmem>>, vector<1x128x1xf32>
    %10 = vector.shape_cast %9 : vector<1x128x1xf32> to vector<128x1xf32>
    %cst_9 = arith.constant dense<0.000000e+00> : vector<128xf32>
    %11 = vector.multi_reduction <add>, %3, %cst_9 [1] : vector<128x128xf32> to vector<128xf32>
    %12 = vector.shape_cast %11 : vector<128xf32> to vector<128x1xf32>
    %13 = arith.addf %10, %12 : vector<128x1xf32>
    %c0_10 = arith.constant 0 : index
    %c0_11 = arith.constant 0 : index
    %c0_12 = arith.constant 0 : index
    %14 = vector.load %arg6[%c0_10, %c0_11, %c0_12] : memref<1x128x1xf32, #tpu.memory_space<vmem>>, vector<1x128x1xf32>
    %15 = vector.shape_cast %14 : vector<1x128x1xf32> to vector<128x1xf32>
    %16 = vector.shape_cast %13 : vector<128x1xf32> to vector<1x128x1xf32>
    tpu.vector_store %arg6[%c0_10, %c0_11, %c0_12], %16 {strides = array<i32>} : memref<1x128x1xf32, #tpu.memory_space<vmem>>, vector<1x128x1xf32>,
    %c0_13 = arith.constant 0 : index
    %c0_14 = arith.constant 0 : index
    %c0_15 = arith.constant 0 : index
    %17 = vector.load %arg7[%c0_13, %c0_14, %c0_15] : memref<1x128x1xf32, #tpu.memory_space<vmem>>, vector<1x128x1xf32>
    %18 = vector.shape_cast %17 : vector<1x128x1xf32> to vector<128x1xf32>
    %19 = arith.mulf %3, %3 : vector<128x128xf32>
    %cst_16 = arith.constant dense<0.000000e+00> : vector<128xf32>
    %20 = vector.multi_reduction <add>, %19, %cst_16 [1] : vector<128x128xf32> to vector<128xf32>
    %21 = vector.shape_cast %20 : vector<128xf32> to vector<128x1xf32>
    %22 = arith.addf %18, %21 : vector<128x1xf32>
    %c0_17 = arith.constant 0 : index
    %c0_18 = arith.constant 0 : index
    %c0_19 = arith.constant 0 : index
    %23 = vector.load %arg7[%c0_17, %c0_18, %c0_19] : memref<1x128x1xf32, #tpu.memory_space<vmem>>, vector<1x128x1xf32>
    %24 = vector.shape_cast %23 : vector<1x128x1xf32> to vector<128x1xf32>
    %25 = vector.shape_cast %22 : vector<128x1xf32> to vector<1x128x1xf32>
    tpu.vector_store %arg7[%c0_17, %c0_18, %c0_19], %25 {strides = array<i32>} : memref<1x128x1xf32, #tpu.memory_space<vmem>>, vector<1x128x1xf32>,
    %26 = arith.truncf %3 : vector<128x128xf32> to vector<128x128xbf16>
    %c0_20 = arith.constant 0 : index
    %c0_21 = arith.constant 0 : index
    %c0_22 = arith.constant 0 : index
    %27 = vector.load %arg5[%c0_20, %c0_21, %c0_22] : memref<1x128x128xbf16, #tpu.memory_space<vmem>>, vector<1x128x128xbf16>
    %28 = vector.shape_cast %27 : vector<1x128x128xbf16> to vector<128x128xbf16>
    %29 = vector.shape_cast %26 : vector<128x128xbf16> to vector<1x128x128xbf16>
    tpu.vector_store %arg5[%c0_20, %c0_21, %c0_22], %29 {strides = array<i32>} : memref<1x128x128xbf16, #tpu.memory_space<vmem>>, vector<1x128x128xbf16>,
    return
  }
  func.func @transform_0(%arg0: i32, %arg1: i32, %arg2: i32) -> (i32, i32, i32) {
    %c1_i32 = arith.constant 1 : i32
    %0 = arith.muli %arg0, %c1_i32 : i32
    %1 = arith.addi %0, %arg2 : i32
    %c0_i32 = arith.constant 0 : i32
    %c0_i32_0 = arith.constant 0 : i32
    return %arg1, %c0_i32, %1 : i32, i32, i32
  }
  func.func @transform_1(%arg0: i32, %arg1: i32, %arg2: i32) -> (i32, i32) {
    %c0_i32 = arith.constant 0 : i32
    %c0_i32_0 = arith.constant 0 : i32
    %c0_i32_1 = arith.constant 0 : i32
    return %c0_i32, %c0_i32_0 : i32, i32
  }
  func.func @transform_2(%arg0: i32, %arg1: i32, %arg2: i32) -> (i32, i32, i32) {
    %c1_i32 = arith.constant 1 : i32
    %0 = arith.muli %arg0, %c1_i32 : i32
    %1 = arith.addi %0, %arg2 : i32
    %c0_i32 = arith.constant 0 : i32
    %c0_i32_0 = arith.constant 0 : i32
    return %arg1, %c0_i32, %1 : i32, i32, i32
  }
  func.func @transform_3(%arg0: i32, %arg1: i32, %arg2: i32) -> (i32, i32, i32) {
    %c0_i32 = arith.constant 0 : i32
    %c0_i32_0 = arith.constant 0 : i32
    %c0_i32_1 = arith.constant 0 : i32
    return %arg0, %c0_i32, %c0_i32_0 : i32, i32, i32
  }
  func.func @transform_4(%arg0: i32, %arg1: i32, %arg2: i32) -> (i32, i32, i32) {
    %c0_i32 = arith.constant 0 : i32
    %c0_i32_0 = arith.constant 0 : i32
    %c0_i32_1 = arith.constant 0 : i32
    return %arg0, %c0_i32, %c0_i32_0 : i32, i32, i32
  }
}

</mosaic_0001>

<bundles_post_ra>
// kernel: tpu_custom_call.1
= control target key start
LH: loop header
LB: loop body
LE: loop exit
PB: predicated region body
PF: predicated region fallthrough
CT: control target
= control target key end

     0   :  { %10 = vsyncpa [#allocation3], 0  ;;  %s2141_s0 = inlined_call_operand.hbm [shape: bf16[2,128,128], index: 0, kind: input, shape index: {}]   ;;  %s2142_s1 = inlined_call_operand.hbm [shape: bf16[128,128], index: 1, kind: input, shape index: {}]   ;;  %s2143_s2 = inlined_call_operand.hbm [shape: bf16[2,128,128], index: 2, kind: output, shape index: {0}]   ;;  %s2144_s3 = inlined_call_operand.vmem [shape: f32[1,128,1], index: 3, kind: output, shape index: {1}]   ;;  %s2145_s4 = inlined_call_operand.vmem [shape: f32[1,128,1], index: 4, kind: output, shape index: {2}]  }
   0x1   :  { %12 = vsyncpa [#allocation3 + $0x1], 0 }
   0x2   :  { %13 = vsyncpa [#allocation6], 0 }
   0x3   :  { %14 = vsyncpa [#allocation4], 0 }
   0x4   :  { %16 = vsyncpa [#allocation4 + $0x1], 0  ;;  %s1440_s15 = smov 0   ;;  %s1442_s16 = smov 0  }
   0x5   :  { %s1444_s17 = smov 0   ;;  %s1446_s18 = smov 0  }
   0x6   :  { %s1448_s19 = smov 0   ;;  %s1450_s20 = smov 0  }
   0x7 LB: > { %s985_s21 = sadd.s32 4294967295, %s1405_s20   ;;  %s986_s22 = sadd.s32 4294967294, %s1405_s20   ;;  %s1405_s20 = sphi %s1450_s20, %s22_s20   ;;  %s1401_s19 = sphi %s1448_s19, %s2169_s19   ;;  %s1397_s18 = sphi %s1446_s18, %s2168_s18   ;;  %s1393_s17 = sphi %s1444_s17, %s2167_s17   ;;  %s1389_s16 = sphi %s1442_s16, %s2166_s16   ;;  %s1385_s15 = sphi %s1440_s15, %s2165_s15  }
   0x8   : > { %p65_p0 = scmp.ne.s32.totalorder %s1389_s16, %s1385_s15  ;;  %p1474_p1 = scmp.eq.s32.totalorder %s985_s21, 0 }
   0x9   : > { %p1478_p2 = scmp.eq.s32.totalorder %s985_s21, 1  ;;  %p120_p3 = scmp.eq.s32.totalorder %s986_s22, 1 }
   0xa   : > { %s2150_s23 = scalar_select %p1474_p1, 1, 0 }
   0xb   : > { %s2151_s24 = scalar_select %p1478_p2, 1, 0 }
   0xc   : > { %p1484_p4 = por %p1474_p1, %p65_p0  ;;  %p987_p5 = scmp.ge.s32.totalorder %s1405_s20, 1 }
   0xd   : > { %p1489_p6 = por %p120_p3, %p65_p0  ;;  %p179_p7 = scmp.lt.s32.totalorder %s1405_s20, 3 }
   0xe   : > { %s2152_s25 = scalar_select %p1484_p4, 1, 0 }
   0xf   : > { %s2153_s26 = scalar_select %p1489_p6, 1, 0 }
  0x10   : > { %p1494_p8 = pnand %p987_p5, %p179_p7  ;;  %s1407_s28 = smov [#allocation5]  }
  0x11   : > { %s191_s29 = sshll.u32 %s1407_s28, 4  ;;  %s37_s5 = sadd.s32 1, %s1401_s19  ;;  %s192_s29 = int_to_ptr.vmem [resolvable:$true] %s191_s29 }
  0x12   : > { %s2154_s27 = scalar_select %p1494_p8, 1, 0 }
  0x13   : > { %p1175_p9 = pneg %p1494_p8  ;;  %s1261_s8 = scalar_lea.hbm %s2142_s1, 1024 }
  0x14   : > { %p1262_p12 = scmp.ne.s32.totalorder %s2142_s1, %s1261_s8  ;;  %p1268_p5 = scmp.lt.u32.totalorder %s1261_s8, %s2142_s1 }
  0x15   : > { %p1503_p11 = pnand %p1175_p9, %p1474_p1 }
  0x17   : > { %p1263_p13 = pneg %p1503_p11 }
  0x19   : > { %p1264_p0 = pnand %p1263_p13, %p1262_p12 }
  0x1b   : > { %p1265_p3 = pneg %p1264_p0 }
  0x1d   : > { %p1270_p7 = pnand %p1268_p5, %p1265_p3 }
  0x1f   : > { %1273 = shalt.err (!%p1270_p7)
}
  0x20   : > { %s1274_s13 = scalar_lea.vmem %s192_s29, 1024  ;;  %p1282_p1 = scmp.lt.s32.totalorder %s192_s29, %s192_s29 }
  0x21   : > { %p1275_p9 = scmp.ne.s32.totalorder %s192_s29, %s1274_s13  ;;  %p1283_p4 = scmp.lt.s32.totalorder %s1274_s13, %s1274_s13 }
  0x23   : > { %p1277_p10 = pnand %p1275_p9, %p1263_p13  ;;  %p1284_p8 = por %p1283_p4, %p1282_p1 }
  0x25   : > { %p1278_p6 = pneg %p1277_p10 }
  0x27   : > { %p1285_p2 = pnand %p1284_p8, %p1278_p6 }
  0x29   : > { %1288 = shalt.err (!%p1285_p2)
}
  0x2a   : > { %s1408_s14 = smov 64   ;;  %s1409_s21 = smov 4  }
  0x2b   : > { %1178 = dma.hbm_to_vmem [thread:$0]  (!%p1503_p11), %s2142_s1, 1024, %s192_s29, [#allocation6], %s1408_s14, %s1408_s14, %s1409_s21  }
  0x2c   : > { %p39_p1 = scmp.ge.s32.totalorder %s37_s5, 2  ;;  %s52_s6 = sadd.s32 1, %s1393_s17 }
  0x2d   : > { %p59_p2 = scmp.ne.s32.totalorder %s1393_s17, %s1389_s16  ;;  %p60_p4 = scmp.eq.s32.totalorder %s1405_s20, 0 }
  0x2e   : > { %s2171_s5 = smov (%p39_p1, %s37_s5), 0  ;;  %p2157_p8 = scmp.ne.s32.totalorder %s2151_s24, 0 }
  0x2f   : > { %p1533_p6 = por %p60_p4, %p59_p2  ;;  %s47_s8 = ssub.s32 %s1401_s19, %s2171_s5 }
  0x30   : > { %p1539_p10 = por %p2157_p8, %p59_p2  ;;  %p1188_p12 = scmp.lt.s32.totalorder %s1405_s20, 2 }
  0x31   : > { %p50_p11 = scmp.eq.s32.totalorder %s47_s8, 0  ;;  %s205_s29 = sand.u32 1, %s1393_s17  }
  0x32   : > { %s990_s9 = sshll.u32 %s205_s29, 6  ;;  %s1037_s11 = sshll.u32 %s1401_s19, 10 }
  0x33   : > { %s1548_s10 = scalar_select %p50_p11, %s1393_s17, %s52_s6  }
  0x34   : > { %s1554_s22 = scalar_lea.hbm %s2141_s0, %s1037_s11  ;;  %s209_s24 = scalar_lea.vmem [#allocation2], %s990_s9 }
  0x35   : > { %s218_s28 = sshll.u32 %s209_s24, 4  ;;  %p1560_p13 = pnand %p1188_p12, %p1533_p6  ;;  %s1556_s28 = int_to_ptr.vmem [resolvable:$true] %s218_s28 }
  0x36   : > { %s1564_s6 = scalar_lea.sflag [#allocation3], %s205_s29  ;;  %s1289_s12 = scalar_lea.hbm %s1554_s22, 1024 }
  0x37   : > { %p1290_p0 = scmp.ne.s32.totalorder %s1554_s22, %s1289_s12  ;;  %p1291_p3 = pneg %p1560_p13 }
  0x38   : > { %s1294_s7 = scalar_lea.hbm %s2141_s0, 2048  ;;  %p1295_p9 = scmp.lt.u32.totalorder %s1554_s22, %s2141_s0 }
  0x39   : > { %p1292_p5 = pnand %p1291_p3, %p1290_p0  ;;  %p1296_p1 = scmp.lt.u32.totalorder %s1294_s7, %s1289_s12 }
  0x3a   : > { %p1298_p4 = scmp.lt.u32.totalorder %s1289_s12, %s1554_s22 }
  0x3b   : > { %p1293_p7 = pneg %p1292_p5  ;;  %p1297_p2 = por %p1296_p1, %p1295_p9 }
  0x3d   : > { %p1299_p6 = por %p1298_p4, %p1297_p2 }
  0x3f   : > { %p1300_p8 = pnand %p1299_p6, %p1293_p7 }
  0x41   : > { %1303 = shalt.err (!%p1300_p8)
}
  0x42   : > { %s1304_s29 = scalar_lea.vmem %s1556_s28, 1024  ;;  %s1410_s9 = smov [#allocation2]  }
  0x43   : > { %p1305_p12 = scmp.ne.s32.totalorder %s1556_s28, %s1304_s29  ;;  %s1309_s11 = sshll.u32 %s1410_s9, 4  ;;  %s1310_s11 = int_to_ptr.vmem [resolvable:$false] %s1309_s11 }
  0x44   : > { %s1311_s13 = scalar_lea.vmem %s1310_s11, 2048  ;;  %p1312_p5 = scmp.lt.s32.totalorder %s1556_s28, %s1310_s11 }
  0x45   : > { %p1307_p11 = pnand %p1305_p12, %p1291_p3  ;;  %p1313_p9 = scmp.lt.s32.totalorder %s1311_s13, %s1304_s29 }
  0x47   : > { %p1308_p0 = pneg %p1307_p11  ;;  %p1314_p1 = por %p1313_p9, %p1312_p5 }
  0x49   : > { %p1315_p2 = pnand %p1314_p1, %p1308_p0 }
  0x4b   : > { %1318 = shalt.err (!%p1315_p2)
}
  0x4c   : > { %1182 = dma.hbm_to_vmem [thread:$0]  (!%p1560_p13), %s1554_s22, 1024, %s1556_s28, %s1564_s6, %s1408_s14, %s1408_s14, %s1409_s21  }
  0x4d   : > { %p2160_p3 = scmp.ne.s32.totalorder %s2154_s27, 0 }
  0x4e   : > { %s1598_s12 = sand.u32 (!%p2160_p3), 1, %s1389_s16   ;;  %p2161_p7 = scmp.ne.s32.totalorder (!%p2160_p3), %s2152_s25, 0 }
  0x4f   : > { %230 = sbr.rel (%p2160_p3) target bundleno = 551 (0x227), region = 28  ;;  %s994_s7 = sshll.u32 (!%p2160_p3), %s1598_s12, 6 }
  0x50   : > { %s233_s24 = scalar_lea.sflag (!%p2160_p3), [#allocation3], %s1598_s12  ;;  %s1604_s8 = scalar_lea.vmem (!%p2160_p3), [#allocation2], %s994_s7 }
  0x56   : > { %1372 = dma.done.wait (%p2161_p7), %s233_s24, 1024  }
  0x57   : > { %1374 = vsyncadd (%p2161_p7), %s233_s24, 4294966272  ;;  %p2162_p13 = scmp.ne.s32.totalorder %s2150_s23, 0 }
  0x59   : > { %1376 = dma.done.wait (%p2162_p13), [#allocation6], 1024  }
  0x5a   : > { %1378 = vsyncadd (%p2162_p13), [#allocation6], 4294966272  ;;  %v1245_v0 = vld [vmem:[%s1604_s8] sm:$0xff]   ;;  %v1246_v1 = vld [vmem:[%s1604_s8 + $0x8] sm:$0xff]   ;;  %p513_p4 = scmp.eq.s32.totalorder %s1397_s18, 0  ;;  %s1657_s23 = scalar_lea.vmem [#allocation7], %s994_s7 }
  0x5b   : > { %1119 = vmatprep.subr.bf16.mxu0 %v1245_v0  ;;  %1151 = vmatprep.subr.bf16.mxu1 %v1245_v0  ;;  %v1247_v2 = vld [vmem:[%s1604_s8 + $0x10] sm:$0xff]   ;;  %v1248_v3 = vld [vmem:[%s1604_s8 + $0x18] sm:$0xff]   ;;  %v1253_v4 = vld [vmem:[#allocation5] sm:$0xff]   ;;  %vm519_vm0 = vcmask (%p513_p4), 7168   ;;  %v1411_v32 = vmov (%p513_p4), 0.0  }
  0x5c   : > { %1120 = vmatpush3.bf16.msra.mxu0 %v1245_v0  ;;  %1159 = vmatpush3.bf16.msra.mxu1 %v1245_v0  ;;  %v1254_v5 = vld [vmem:[#allocation5 + $0x20] sm:$0xff]   ;;  %v1250_v7 = vld [vmem:[%s1604_s8 + $0x28] sm:$0xff]   ;;  %v1251_v8 = vld [vmem:[%s1604_s8 + $0x30] sm:$0xff]   ;;  %520 = vst.msk [vmem:[%s2144_s3] sm:$0xff] (%p513_p4), %vm519_vm0, %v1411_v32 }
  0x5d   : > { %1121 = vmatprep.subr.bf16.mxu0 %v1246_v1  ;;  %1152 = vmatprep.subr.bf16.mxu1 %v1246_v1  ;;  %v1249_v6 = vld [vmem:[%s1604_s8 + $0x20] sm:$0xff]   ;;  %v1252_v9 = vld [vmem:[%s1604_s8 + $0x38] sm:$0xff]   ;;  %v1255_v10 = vld [vmem:[#allocation5 + $0x8] sm:$0xff]   ;;  %521 = vst.msk [vmem:[%s2144_s3 + $0x8] sm:$0xff] (%p513_p4), %vm519_vm0, %v1411_v32 }
  0x5e   : > { %1135 = vmatprep.mubr.bf16.mxu0 %v1253_v4  ;;  %1143 = vmatprep.mubr.bf16.mxu1 %v1254_v5  ;;  %v1256_v11 = vld [vmem:[#allocation5 + $0x28] sm:$0xff]   ;;  %v1257_v12 = vld [vmem:[#allocation5 + $0x10] sm:$0xff]   ;;  %v1259_v14 = vld [vmem:[#allocation5 + $0x18] sm:$0xff]   ;;  %522 = vst.msk [vmem:[%s2144_s3 + $0x10] sm:$0xff] (%p513_p4), %vm519_vm0, %v1411_v32 }
  0x5f   : > { %v1258_v13 = vld [vmem:[#allocation5 + $0x30] sm:$0xff]   ;;  %v1260_v15 = vld [vmem:[#allocation5 + $0x38] sm:$0xff]   ;;  %523 = vst.msk [vmem:[%s2144_s3 + $0x18] sm:$0xff] (%p513_p4), %vm519_vm0, %v1411_v32  ;;  %524 = vst.msk [vmem:[%s2144_s3 + $0x20] sm:$0xff] (%p513_p4), %vm519_vm0, %v1411_v32 }
  0x60   : > { %1122 = vmatpush3.bf16.msra.mxu0 %v1246_v1  ;;  %1160 = vmatpush3.bf16.msra.mxu1 %v1246_v1  ;;  %525 = vst.msk [vmem:[%s2144_s3 + $0x28] sm:$0xff] (%p513_p4), %vm519_vm0, %v1411_v32  ;;  %526 = vst.msk [vmem:[%s2144_s3 + $0x30] sm:$0xff] (%p513_p4), %vm519_vm0, %v1411_v32 }
  0x61   : > { %1123 = vmatprep.subr.bf16.mxu0 %v1247_v2  ;;  %1153 = vmatprep.subr.bf16.mxu1 %v1247_v2  ;;  %527 = vst.msk [vmem:[%s2144_s3 + $0x38] sm:$0xff] (%p513_p4), %vm519_vm0, %v1411_v32  ;;  %528 = vst.msk [vmem:[%s2144_s3 + $0x40] sm:$0xff] (%p513_p4), %vm519_vm0, %v1411_v32 }
  0x62   : > { %529 = vst.msk [vmem:[%s2144_s3 + $0x48] sm:$0xff] (%p513_p4), %vm519_vm0, %v1411_v32  ;;  %530 = vst.msk [vmem:[%s2144_s3 + $0x50] sm:$0xff] (%p513_p4), %vm519_vm0, %v1411_v32 }
  0x63   : > { %531 = vst.msk [vmem:[%s2144_s3 + $0x58] sm:$0xff] (%p513_p4), %vm519_vm0, %v1411_v32  ;;  %532 = vst.msk [vmem:[%s2144_s3 + $0x60] sm:$0xff] (%p513_p4), %vm519_vm0, %v1411_v32 }
  0x64   : > { %1124 = vmatpush3.bf16.msra.mxu0 %v1247_v2  ;;  %1161 = vmatpush3.bf16.msra.mxu1 %v1247_v2  ;;  %533 = vst.msk [vmem:[%s2144_s3 + $0x68] sm:$0xff] (%p513_p4), %vm519_vm0, %v1411_v32  ;;  %534 = vst.msk [vmem:[%s2144_s3 + $0x70] sm:$0xff] (%p513_p4), %vm519_vm0, %v1411_v32 }
  0x65   : > { %1125 = vmatprep.subr.bf16.mxu0 %v1248_v3  ;;  %1154 = vmatprep.subr.bf16.mxu1 %v1248_v3  ;;  %535 = vst.msk [vmem:[%s2144_s3 + $0x78] sm:$0xff] (%p513_p4), %vm519_vm0, %v1411_v32  ;;  %536 = vst.msk [vmem:[%s2145_s4] sm:$0xff] (%p513_p4), %vm519_vm0, %v1411_v32 }
  0x66   : > { %537 = vst.msk [vmem:[%s2145_s4 + $0x8] sm:$0xff] (%p513_p4), %vm519_vm0, %v1411_v32  ;;  %538 = vst.msk [vmem:[%s2145_s4 + $0x10] sm:$0xff] (%p513_p4), %vm519_vm0, %v1411_v32 }
  0x67   : > { %539 = vst.msk [vmem:[%s2145_s4 + $0x18] sm:$0xff] (%p513_p4), %vm519_vm0, %v1411_v32  ;;  %540 = vst.msk [vmem:[%s2145_s4 + $0x20] sm:$0xff] (%p513_p4), %vm519_vm0, %v1411_v32 }
  0x68   : > { %1126 = vmatpush3.bf16.msra.mxu0 %v1248_v3  ;;  %1162 = vmatpush3.bf16.msra.mxu1 %v1248_v3  ;;  %541 = vst.msk [vmem:[%s2145_s4 + $0x28] sm:$0xff] (%p513_p4), %vm519_vm0, %v1411_v32  ;;  %542 = vst.msk [vmem:[%s2145_s4 + $0x30] sm:$0xff] (%p513_p4), %vm519_vm0, %v1411_v32 }
  0x69   : > { %1127 = vmatprep.subr.bf16.mxu0 %v1249_v6  ;;  %1155 = vmatprep.subr.bf16.mxu1 %v1249_v6  ;;  %543 = vst.msk [vmem:[%s2145_s4 + $0x38] sm:$0xff] (%p513_p4), %vm519_vm0, %v1411_v32  ;;  %544 = vst.msk [vmem:[%s2145_s4 + $0x40] sm:$0xff] (%p513_p4), %vm519_vm0, %v1411_v32 }
  0x6a   : > { %545 = vst.msk [vmem:[%s2145_s4 + $0x48] sm:$0xff] (%p513_p4), %vm519_vm0, %v1411_v32  ;;  %546 = vst.msk [vmem:[%s2145_s4 + $0x50] sm:$0xff] (%p513_p4), %vm519_vm0, %v1411_v32 }
  0x6b   : > { %547 = vst.msk [vmem:[%s2145_s4 + $0x58] sm:$0xff] (%p513_p4), %vm519_vm0, %v1411_v32  ;;  %548 = vst.msk [vmem:[%s2145_s4 + $0x60] sm:$0xff] (%p513_p4), %vm519_vm0, %v1411_v32 }
  0x6c   : > { %1128 = vmatpush3.bf16.msra.mxu0 %v1249_v6  ;;  %1163 = vmatpush3.bf16.msra.mxu1 %v1249_v6  ;;  %549 = vst.msk [vmem:[%s2145_s4 + $0x68] sm:$0xff] (%p513_p4), %vm519_vm0, %v1411_v32  ;;  %550 = vst.msk [vmem:[%s2145_s4 + $0x70] sm:$0xff] (%p513_p4), %vm519_vm0, %v1411_v32 }
  0x6d   : > { %1129 = vmatprep.subr.bf16.mxu0 %v1250_v7  ;;  %1156 = vmatprep.subr.bf16.mxu1 %v1250_v7  ;;  %551 = vst.msk [vmem:[%s2145_s4 + $0x78] sm:$0xff] (%p513_p4), %vm519_vm0, %v1411_v32 }
  0x70   : > { %1130 = vmatpush3.bf16.msra.mxu0 %v1250_v7  ;;  %1164 = vmatpush3.bf16.msra.mxu1 %v1250_v7 }
  0x71   : > { %1131 = vmatprep.subr.bf16.mxu0 %v1251_v8  ;;  %1157 = vmatprep.subr.bf16.mxu1 %v1251_v8 }
  0x74   : > { %1132 = vmatpush3.bf16.msra.mxu0 %v1251_v8  ;;  %1165 = vmatpush3.bf16.msra.mxu1 %v1251_v8 }
  0x75   : > { %1133 = vmatprep.subr.bf16.mxu0 %v1252_v9  ;;  %1158 = vmatprep.subr.bf16.mxu1 %v1252_v9 }
  0x78   : > { %1134 = vmatpush3.bf16.msra.mxu0 %v1252_v9  ;;  %1166 = vmatpush3.bf16.msra.mxu1 %v1252_v9 }
  0x7b   : > { %1136 = vmatmul.mubr.bf16.vlgmr.msra.gmra.mrb[0].mxu0 %v1255_v10  ;;  %1144 = vmatmul.mubr.bf16.vlgmr.msra.gmra.mrb[0].mxu1 %v1256_v11 }
  0x7c   : > { %1139 = vmatprep.mubr.bf16.mxu0 %v1257_v12  ;;  %1147 = vmatprep.mubr.bf16.mxu1 %v1258_v13 }
  0x83   : > { %1140 = vmatmul.mubr.bf16.gmra.mrb[4].mxu0 %v1259_v14  ;;  %1148 = vmatmul.mubr.bf16.gmra.mrb[4].mxu1 %v1260_v15 }
 0x14e   : > { %v1623_v16 = vpop.f32.mrb[0].mxu0  ;;  %v1625_v17 = vpop.f32.mrb[0].mxu1 }
 0x14f   : > { %v1627_v18 = vpop.f32.mrb[1].mxu0  ;;  %v1629_v19 = vpop.f32.mrb[1].mxu1 }
 0x150   : > { %v1631_v20 = vpop.f32.mrb[2].mxu0  ;;  %v1633_v21 = vpop.f32.mrb[2].mxu1 }
 0x151   : > { %v1635_v22 = vpop.f32.mrb[3].mxu0  ;;  %v1637_v23 = vpop.f32.mrb[3].mxu1 }
 0x153   : > { %518 = sbr.rel (!%p513_p4) target bundleno = 346 (0x15a), region = 40 }
 0x156   : > { %v1639_v24 = vpop.f32.mrb[4].mxu0  ;;  %v1641_v25 = vpop.f32.mrb[4].mxu1 }
 0x157   : > { %v1643_v26 = vpop.f32.mrb[5].mxu0  ;;  %v1645_v27 = vpop.f32.mrb[5].mxu1 }
 0x158   : > { %v1647_v28 = vpop.f32.mrb[6].mxu0  ;;  %v1649_v29 = vpop.f32.mrb[6].mxu1 }
 0x159   : > { %v1651_v30 = vpop.f32.mrb[7].mxu0  ;;  %v1653_v31 = vpop.f32.mrb[7].mxu1 }
 0x15a PF: > { %572 = vadd.xlane.f32.xlu1 %v1623_v16  ;;  %568 = vadd.xlane.f32.xlu0 %v1627_v18  ;;  %v650_v33 = vmul.f32 %v1635_v22, %v1635_v22  ;;  %v649_v34 = vmul.f32 %v1627_v18, %v1627_v18  ;;  %v652_v35 = vmul.f32 %v1631_v20, %v1631_v20  ;;  %s1055_s9 = sshll.u32 %s1397_s18, 10  ;;  %s835_s11 = sshll.u32 %s1657_s23, 4  ;;  %s1868_s11 = int_to_ptr.vmem [resolvable:$true] %s835_s11 }
 0x15b   : > { %v651_v36 = vmul.f32 %v1623_v16, %v1623_v16  ;;  %v654_v37 = vmul.f32 %v1651_v30, %v1651_v30  ;;  %v653_v38 = vmul.f32 %v1643_v26, %v1643_v26  ;;  %v656_v39 = vmul.f32 %v1647_v28, %v1647_v28  ;;  %s1862_s24 = scalar_lea.hbm %s2143_s2, %s1055_s9  ;;  %s810_s18 = scalar_lea.sflag [#allocation4], %s1598_s12 }
 0x15c   : > { %v655_v40 = vmul.f32 %v1639_v24, %v1639_v24  ;;  %v658_v41 = vmul.f32 %v1637_v23, %v1637_v23  ;;  %v657_v42 = vmul.f32 %v1629_v19, %v1629_v19  ;;  %v660_v43 = vmul.f32 %v1633_v21, %v1633_v21  ;;  %s1319_s8 = scalar_lea.vmem %s1868_s11, 1024  ;;  %s1412_s25 = smov [#allocation7]  }
 0x15d   : > { %v659_v44 = vmul.f32 %v1625_v17, %v1625_v17  ;;  %v662_v45 = vmul.f32 %v1653_v31, %v1653_v31  ;;  %v661_v46 = vmul.f32 %v1645_v27, %v1645_v27  ;;  %v664_v47 = vmul.f32 %v1649_v29, %v1649_v29  ;;  %p1320_p6 = scmp.ne.s32.totalorder %s1868_s11, %s1319_s8  ;;  %s1323_s27 = sshll.u32 %s1412_s25, 4  ;;  %s1324_s27 = int_to_ptr.vmem [resolvable:$false] %s1323_s27 }
 0x15e   : > { %574 = vadd.xlane.f32.xlu1 %v1631_v20  ;;  %570 = vadd.xlane.f32.xlu0 %v1635_v22  ;;  %v663_v48 = vmul.f32 %v1641_v25, %v1641_v25  ;;  %v1059_v49 = vpack.c.bf16 %v1635_v22, %v1627_v18  ;;  %v1064_v50 = vpack.c.bf16 %v1631_v20, %v1623_v16  ;;  %s1325_s14 = scalar_lea.vmem %s1324_s27, 2048  ;;  %p1326_p11 = scmp.lt.s32.totalorder %s1868_s11, %s1324_s27 }
 0x15f   : > { %v1069_v51 = vpack.c.bf16 %v1651_v30, %v1643_v26  ;;  %v1074_v52 = vpack.c.bf16 %v1647_v28, %v1639_v24  ;;  %v1079_v53 = vpack.c.bf16 %v1637_v23, %v1629_v19  ;;  %v1084_v54 = vpack.c.bf16 %v1633_v21, %v1625_v17  ;;  %p1321_p8 = pnand %p1320_p6, %p1539_p10  ;;  %p1327_p0 = scmp.lt.s32.totalorder %s1325_s14, %s1319_s8 }
 0x160   : > { %v1089_v55 = vpack.c.bf16 %v1653_v31, %v1645_v27  ;;  %v1094_v56 = vpack.c.bf16 %v1649_v29, %v1641_v25  ;;  %1060 = vst [vmem:[%s1657_s23] sm:$0xff] %v1059_v49   ;;  %1096 = vst [vmem:[%s1657_s23 + $0x8] sm:$0xff] %v1064_v50  }
 0x161   : > { %1097 = vst [vmem:[%s1657_s23 + $0x10] sm:$0xff] %v1069_v51   ;;  %1098 = vst [vmem:[%s1657_s23 + $0x18] sm:$0xff] %v1074_v52   ;;  %p1322_p12 = pneg %p1321_p8  ;;  %p1328_p5 = por %p1327_p0, %p1326_p11 }
 0x162   : > { %578 = vadd.xlane.f32.xlu1 %v1651_v30  ;;  %576 = vadd.xlane.f32.xlu0 %v1643_v26  ;;  %1099 = vst [vmem:[%s1657_s23 + $0x20] sm:$0xff] %v1079_v53   ;;  %1100 = vst [vmem:[%s1657_s23 + $0x28] sm:$0xff] %v1084_v54  }
 0x163   : > { %1101 = vst [vmem:[%s1657_s23 + $0x30] sm:$0xff] %v1089_v55   ;;  %1102 = vst [vmem:[%s1657_s23 + $0x38] sm:$0xff] %v1094_v56   ;;  %p1329_p9 = pnand %p1328_p5, %p1322_p12 }
 0x166   : > { %582 = vadd.xlane.f32.xlu1 %v1647_v28  ;;  %580 = vadd.xlane.f32.xlu0 %v1639_v24 }
 0x16a   : > { %586 = vadd.xlane.f32.xlu1 %v1637_v23  ;;  %584 = vadd.xlane.f32.xlu0 %v1629_v19 }
 0x16e   : > { %590 = vadd.xlane.f32.xlu1 %v1633_v21  ;;  %588 = vadd.xlane.f32.xlu0 %v1625_v17 }
 0x172   : > { %594 = vadd.xlane.f32.xlu1 %v1653_v31  ;;  %592 = vadd.xlane.f32.xlu0 %v1645_v27 }
 0x176   : > { %598 = vadd.xlane.f32.xlu1 %v1649_v29  ;;  %596 = vadd.xlane.f32.xlu0 %v1641_v25 }
 0x17a   : > { %667 = vadd.xlane.f32.xlu1 %v650_v33  ;;  %665 = vadd.xlane.f32.xlu0 %v649_v34 }
 0x17e   : > { %671 = vadd.xlane.f32.xlu1 %v652_v35  ;;  %669 = vadd.xlane.f32.xlu0 %v651_v36 }
 0x182   : > { %675 = vadd.xlane.f32.xlu1 %v654_v37  ;;  %673 = vadd.xlane.f32.xlu0 %v653_v38 }
 0x186   : > { %679 = vadd.xlane.f32.xlu1 %v656_v39  ;;  %677 = vadd.xlane.f32.xlu0 %v655_v40 }
 0x18a   : > { %683 = vadd.xlane.f32.xlu1 %v658_v41  ;;  %681 = vadd.xlane.f32.xlu0 %v657_v42 }
 0x18e   : > { %687 = vadd.xlane.f32.xlu1 %v660_v43  ;;  %685 = vadd.xlane.f32.xlu0 %v659_v44 }
 0x192   : > { %691 = vadd.xlane.f32.xlu1 %v662_v45  ;;  %689 = vadd.xlane.f32.xlu0 %v661_v46 }
 0x196   : > { %695 = vadd.xlane.f32.xlu1 %v664_v47  ;;  %693 = vadd.xlane.f32.xlu0 %v663_v48 }
 0x197   : > { %1332 = shalt.err (!%p1329_p9)
}
 0x198   : > { %s1333_s23 = scalar_lea.hbm %s1862_s24, 1024  ;;  %s1337_s28 = scalar_lea.hbm %s2143_s2, 2048 }
 0x199   : > { %p1334_p1 = scmp.ne.s32.totalorder %s1862_s24, %s1333_s23  ;;  %p1338_p7 = scmp.lt.u32.totalorder %s1862_s24, %s2143_s2 }
 0x19a   : > { %p1339_p13 = scmp.lt.u32.totalorder %s1337_s28, %s1333_s23  ;;  %p1341_p6 = scmp.lt.u32.totalorder %s1333_s23, %s1862_s24 }
 0x19b   : > { %p1335_p2 = pnand %p1334_p1, %p1539_p10 }
 0x19c   : > { %p1340_p4 = por %p1339_p13, %p1338_p7 }
 0x19d   : > { %p1336_p3 = pneg %p1335_p2 }
 0x19e   : > { %p1342_p8 = por %p1341_p6, %p1340_p4 }
 0x1a0   : > { %p1343_p12 = pnand %p1342_p8, %p1336_p3 }
 0x1a2   : > { %1346 = shalt.err (!%p1343_p12)
}
 0x1a3   : > { %s1413_s9 = smov 64   ;;  %s1414_s13 = smov 4   ;;  %v554_v57 = vld [vmem:[%s2144_s3 + $0x10] sm:$0xff]  ;;  %v552_v58 = vld [vmem:[%s2144_s3] sm:$0xff]  ;;  %vm616_vm1 = vcmask 7168   ;;  %v555_v63 = vld [vmem:[%s2144_s3 + $0x18] sm:$0xff] }
 0x1a4   : > { %1173 = dma.vmem_to_hbm [thread:$0]  (%p1539_p10), %s1868_s11, 1024, %s1862_s24, %s810_s18, %s1413_s9, %s1413_s9, %s1414_s13  }
 0x1a5   : > { %v553_v0 = vld [vmem:[%s2144_s3 + $0x8] sm:$0xff]  ;;  %v556_v6 = vld [vmem:[%s2144_s3 + $0x20] sm:$0xff]  ;;  %v559_v11 = vld [vmem:[%s2144_s3 + $0x38] sm:$0xff] }
 0x1a6   : > { %v557_v5 = vld [vmem:[%s2144_s3 + $0x28] sm:$0xff]  ;;  %v558_v12 = vld [vmem:[%s2144_s3 + $0x30] sm:$0xff]  ;;  %v560_v18 = vld [vmem:[%s2144_s3 + $0x40] sm:$0xff] }
 0x1a7   : > { %v561_v17 = vld [vmem:[%s2144_s3 + $0x48] sm:$0xff]  ;;  %v563_v23 = vld [vmem:[%s2144_s3 + $0x58] sm:$0xff]  ;;  %v562_v24 = vld [vmem:[%s2144_s3 + $0x50] sm:$0xff] }
 0x1a8   : > { %v565_v29 = vld [vmem:[%s2144_s3 + $0x68] sm:$0xff]  ;;  %v564_v30 = vld [vmem:[%s2144_s3 + $0x60] sm:$0xff]  ;;  %v567_v35 = vld [vmem:[%s2144_s3 + $0x78] sm:$0xff] }
 0x1a9   : > { %v566_v36 = vld [vmem:[%s2144_s3 + $0x70] sm:$0xff]  ;;  %v634_v41 = vld [vmem:[%s2145_s4 + $0x8] sm:$0xff]  ;;  %v633_v42 = vld [vmem:[%s2145_s4] sm:$0xff] }
 0x1aa   : > { %v636_v47 = vld [vmem:[%s2145_s4 + $0x18] sm:$0xff]  ;;  %v635_v48 = vld [vmem:[%s2145_s4 + $0x10] sm:$0xff]  ;;  %v638_v53 = vld [vmem:[%s2145_s4 + $0x28] sm:$0xff] }
 0x1ab   : > { %v637_v54 = vld [vmem:[%s2145_s4 + $0x20] sm:$0xff] }
 0x1e7   : > { %v573_v59 = vpop.xlane.xlu1 %572  ;;  %v569_v60 = vpop.xlane.xlu0 %568 }
 0x1e8   : > { %v602_v61 = vadd.f32 %v573_v59, %v554_v57  ;;  %v600_v62 = vadd.f32 %v569_v60, %v552_v58  ;;  %v640_v59 = vld [vmem:[%s2145_s4 + $0x38] sm:$0xff]  ;;  %v639_v60 = vld [vmem:[%s2145_s4 + $0x30] sm:$0xff] }
 0x1ea   : > { %619 = vst.msk [vmem:[%s2144_s3 + $0x10] sm:$0xff] %vm616_vm1, %v602_v61  ;;  %617 = vst.msk [vmem:[%s2144_s3] sm:$0xff] %vm616_vm1, %v600_v62 }
 0x1eb   : > { %v575_v1 = vpop.xlane.xlu1 %574  ;;  %v571_v2 = vpop.xlane.xlu0 %570 }
 0x1ec   : > { %v603_v3 = vadd.f32 %v575_v1, %v555_v63  ;;  %v601_v4 = vadd.f32 %v571_v2, %v553_v0  ;;  %v642_v1 = vld [vmem:[%s2145_s4 + $0x48] sm:$0xff]  ;;  %v641_v2 = vld [vmem:[%s2145_s4 + $0x40] sm:$0xff] }
 0x1ee   : > { %620 = vst.msk [vmem:[%s2144_s3 + $0x18] sm:$0xff] %vm616_vm1, %v603_v3  ;;  %618 = vst.msk [vmem:[%s2144_s3 + $0x8] sm:$0xff] %vm616_vm1, %v601_v4 }
 0x1ef   : > { %v579_v7 = vpop.xlane.xlu1 %578  ;;  %v577_v8 = vpop.xlane.xlu0 %576 }
 0x1f0   : > { %v605_v9 = vadd.f32 %v579_v7, %v557_v5  ;;  %v604_v10 = vadd.f32 %v577_v8, %v556_v6  ;;  %v644_v7 = vld [vmem:[%s2145_s4 + $0x58] sm:$0xff]  ;;  %v643_v8 = vld [vmem:[%s2145_s4 + $0x50] sm:$0xff] }
 0x1f2   : > { %622 = vst.msk [vmem:[%s2144_s3 + $0x28] sm:$0xff] %vm616_vm1, %v605_v9  ;;  %621 = vst.msk [vmem:[%s2144_s3 + $0x20] sm:$0xff] %vm616_vm1, %v604_v10 }
 0x1f3   : > { %v583_v13 = vpop.xlane.xlu1 %582  ;;  %v581_v14 = vpop.xlane.xlu0 %580 }
 0x1f4   : > { %v607_v15 = vadd.f32 %v583_v13, %v559_v11  ;;  %v606_v16 = vadd.f32 %v581_v14, %v558_v12  ;;  %v646_v13 = vld [vmem:[%s2145_s4 + $0x68] sm:$0xff]  ;;  %v645_v14 = vld [vmem:[%s2145_s4 + $0x60] sm:$0xff] }
 0x1f6   : > { %624 = vst.msk [vmem:[%s2144_s3 + $0x38] sm:$0xff] %vm616_vm1, %v607_v15  ;;  %623 = vst.msk [vmem:[%s2144_s3 + $0x30] sm:$0xff] %vm616_vm1, %v606_v16 }
 0x1f7   : > { %v587_v19 = vpop.xlane.xlu1 %586  ;;  %v585_v20 = vpop.xlane.xlu0 %584 }
 0x1f8   : > { %v609_v21 = vadd.f32 %v587_v19, %v561_v17  ;;  %v608_v22 = vadd.f32 %v585_v20, %v560_v18  ;;  %v648_v19 = vld [vmem:[%s2145_s4 + $0x78] sm:$0xff]  ;;  %v647_v20 = vld [vmem:[%s2145_s4 + $0x70] sm:$0xff] }
 0x1fa   : > { %626 = vst.msk [vmem:[%s2144_s3 + $0x48] sm:$0xff] %vm616_vm1, %v609_v21  ;;  %625 = vst.msk [vmem:[%s2144_s3 + $0x40] sm:$0xff] %vm616_vm1, %v608_v22 }
 0x1fb   : > { %v591_v25 = vpop.xlane.xlu1 %590  ;;  %v589_v26 = vpop.xlane.xlu0 %588 }
 0x1fc   : > { %v611_v27 = vadd.f32 %v591_v25, %v563_v23  ;;  %v610_v28 = vadd.f32 %v589_v26, %v562_v24 }
 0x1fe   : > { %628 = vst.msk [vmem:[%s2144_s3 + $0x58] sm:$0xff] %vm616_vm1, %v611_v27  ;;  %627 = vst.msk [vmem:[%s2144_s3 + $0x50] sm:$0xff] %vm616_vm1, %v610_v28 }
 0x1ff   : > { %v595_v31 = vpop.xlane.xlu1 %594  ;;  %v593_v32 = vpop.xlane.xlu0 %592 }
 0x200   : > { %v613_v33 = vadd.f32 %v595_v31, %v565_v29  ;;  %v612_v34 = vadd.f32 %v593_v32, %v564_v30 }
 0x202   : > { %630 = vst.msk [vmem:[%s2144_s3 + $0x68] sm:$0xff] %vm616_vm1, %v613_v33  ;;  %629 = vst.msk [vmem:[%s2144_s3 + $0x60] sm:$0xff] %vm616_vm1, %v612_v34 }
 0x203   : > { %v599_v37 = vpop.xlane.xlu1 %598  ;;  %v597_v38 = vpop.xlane.xlu0 %596 }
 0x204   : > { %v615_v39 = vadd.f32 %v599_v37, %v567_v35  ;;  %v614_v40 = vadd.f32 %v597_v38, %v566_v36 }
 0x206   : > { %632 = vst.msk [vmem:[%s2144_s3 + $0x78] sm:$0xff] %vm616_vm1, %v615_v39  ;;  %631 = vst.msk [vmem:[%s2144_s3 + $0x70] sm:$0xff] %vm616_vm1, %v614_v40 }
 0x207   : > { %v668_v43 = vpop.xlane.xlu1 %667  ;;  %v666_v44 = vpop.xlane.xlu0 %665 }
 0x208   : > { %v698_v45 = vadd.f32 %v668_v43, %v634_v41  ;;  %v697_v46 = vadd.f32 %v666_v44, %v633_v42 }
 0x20a   : > { %714 = vst.msk [vmem:[%s2145_s4 + $0x8] sm:$0xff] %vm616_vm1, %v698_v45  ;;  %713 = vst.msk [vmem:[%s2145_s4] sm:$0xff] %vm616_vm1, %v697_v46 }
 0x20b   : > { %v672_v49 = vpop.xlane.xlu1 %671  ;;  %v670_v50 = vpop.xlane.xlu0 %669 }
 0x20c   : > { %v700_v51 = vadd.f32 %v672_v49, %v636_v47  ;;  %v699_v52 = vadd.f32 %v670_v50, %v635_v48 }
 0x20e   : > { %716 = vst.msk [vmem:[%s2145_s4 + $0x18] sm:$0xff] %vm616_vm1, %v700_v51  ;;  %715 = vst.msk [vmem:[%s2145_s4 + $0x10] sm:$0xff] %vm616_vm1, %v699_v52 }
 0x20f   : > { %v676_v55 = vpop.xlane.xlu1 %675  ;;  %v674_v56 = vpop.xlane.xlu0 %673 }
 0x210   : > { %v702_v57 = vadd.f32 %v676_v55, %v638_v53  ;;  %v701_v58 = vadd.f32 %v674_v56, %v637_v54 }
 0x212   : > { %718 = vst.msk [vmem:[%s2145_s4 + $0x28] sm:$0xff] %vm616_vm1, %v702_v57  ;;  %717 = vst.msk [vmem:[%s2145_s4 + $0x20] sm:$0xff] %vm616_vm1, %v701_v58 }
 0x213   : > { %v680_v61 = vpop.xlane.xlu1 %679  ;;  %v678_v62 = vpop.xlane.xlu0 %677 }
 0x214   : > { %v704_v63 = vadd.f32 %v680_v61, %v640_v59  ;;  %v703_v0 = vadd.f32 %v678_v62, %v639_v60 }
 0x216   : > { %720 = vst.msk [vmem:[%s2145_s4 + $0x38] sm:$0xff] %vm616_vm1, %v704_v63  ;;  %719 = vst.msk [vmem:[%s2145_s4 + $0x30] sm:$0xff] %vm616_vm1, %v703_v0 }
 0x217   : > { %v684_v3 = vpop.xlane.xlu1 %683  ;;  %v682_v4 = vpop.xlane.xlu0 %681 }
 0x218   : > { %v706_v5 = vadd.f32 %v684_v3, %v642_v1  ;;  %v705_v6 = vadd.f32 %v682_v4, %v641_v2 }
 0x21a   : > { %722 = vst.msk [vmem:[%s2145_s4 + $0x48] sm:$0xff] %vm616_vm1, %v706_v5  ;;  %721 = vst.msk [vmem:[%s2145_s4 + $0x40] sm:$0xff] %vm616_vm1, %v705_v6 }
 0x21b   : > { %v688_v9 = vpop.xlane.xlu1 %687  ;;  %v686_v10 = vpop.xlane.xlu0 %685 }
 0x21c   : > { %v708_v11 = vadd.f32 %v688_v9, %v644_v7  ;;  %v707_v12 = vadd.f32 %v686_v10, %v643_v8 }
 0x21e   : > { %724 = vst.msk [vmem:[%s2145_s4 + $0x58] sm:$0xff] %vm616_vm1, %v708_v11  ;;  %723 = vst.msk [vmem:[%s2145_s4 + $0x50] sm:$0xff] %vm616_vm1, %v707_v12 }
 0x21f   : > { %v692_v15 = vpop.xlane.xlu1 %691  ;;  %v690_v16 = vpop.xlane.xlu0 %689 }
 0x220   : > { %v710_v17 = vadd.f32 %v692_v15, %v646_v13  ;;  %v709_v18 = vadd.f32 %v690_v16, %v645_v14 }
 0x222   : > { %726 = vst.msk [vmem:[%s2145_s4 + $0x68] sm:$0xff] %vm616_vm1, %v710_v17  ;;  %725 = vst.msk [vmem:[%s2145_s4 + $0x60] sm:$0xff] %vm616_vm1, %v709_v18 }
 0x223   : > { %v696_v21 = vpop.xlane.xlu1 %695  ;;  %v694_v22 = vpop.xlane.xlu0 %693 }
 0x224   : > { %v712_v23 = vadd.f32 %v696_v21, %v648_v19  ;;  %v711_v24 = vadd.f32 %v694_v22, %v647_v20 }
 0x226   : > { %728 = vst.msk [vmem:[%s2145_s4 + $0x78] sm:$0xff] %vm616_vm1, %v712_v23  ;;  %727 = vst.msk [vmem:[%s2145_s4 + $0x70] sm:$0xff] %vm616_vm1, %v711_v24 }
 0x227 PF: > { %s872_s25 = sand.u32 1, %s1385_s15   ;;  %p2163_p10 = scmp.ne.s32.totalorder %s2153_s26, 0 }
 0x228   : > { %p2164_p11 = scmp.ge.s32.totalorder %s1405_s20, 2  ;;  %s873_s27 = scalar_lea.sflag [#allocation4], %s872_s25 }
 0x22a   : > { %p1184_p0 = pnand %p2164_p11, %p2163_p10 }
 0x22c   : > { %1380 = dma.done.wait (!%p1184_p0), %s873_s27, 1024  }
 0x22d   : > { %1382 = vsyncadd (!%p1184_p0), %s873_s27, 4294966272  ;;  %s22_s20 = sadd.s32 1, %s1405_s20   ;;  %s2165_s15 = smov %s1389_s16 }
 0x22e   : > { %p19_p5 = scmp.ge.s32.totalorder %s22_s20, 4   ;;  %s2166_s16 = smov %s1393_s17 }
 0x22f   : > { %s2167_s17 = smov %s1548_s10  ;;  %s2168_s18 = smov %s1401_s19 }
 0x230   : > { %s2169_s19 = smov %s2171_s5  ;;  %21 = sbr.rel (!%p19_p5) target bundleno = 7 (0x7), region = 105 }
 0x237   :  { %878 = vsyncpa [#allocation3], 1 }
 0x238   :  { %880 = vsyncpa [#allocation3 + $0x1], 1 }
 0x239   :  { %881 = vsyncpa [#allocation6], 1 }
 0x23a   :  { %882 = vsyncpa [#allocation4], 1 }
 0x23b   :  { %884 = vsyncpa [#allocation4 + $0x1], 1 }

</bundles_post_ra>
